<compile_context>
chip_gen: v7x
topology: tpu7x:2x2x1
jax: 0.10.0
libtpu: 0.0.40
codegen_flags: <defaults>
</compile_context>

<pallas_src>
import math
import functools

import jax
import jax.numpy as jnp
from jax import lax
from jax.experimental import pallas as pl
from jax.experimental.pallas import tpu as pltpu

LN_EPS = 1e-5


# ----------------------------------------------------------------------------- helpers

def _round_up(n, m):
    return ((n + m - 1) // m) * m


def _pack_consts(named_arrays):
    """Pack small (1, w) f32 vectors into one lane-aligned slab.

    Returns (slab, layout) where layout is a static tuple of (name, offset, width)
    with every offset a multiple of 128 lanes.
    """
    layout, parts, cur = [], [], 0
    for name, arr in named_arrays:
        arr = arr.astype(jnp.float32)
        w = arr.shape[1]
        pw = _round_up(w, 128)
        layout.append((name, cur, w))
        parts.append(jnp.pad(arr, ((0, 0), (0, pw - w))))
        cur += pw
    return jnp.concatenate(parts, axis=1), tuple(layout)


def _unpack_consts(consts_ref, layout):
    # Static, lane-aligned slices of the packed (1, K) f32 slab.
    return {name: consts_ref[:, off:off + w] for name, off, w in layout}


def _layernorm(x, gamma, beta):
    # x: (S, E) f32, gamma/beta: (1, E) f32; normalize over last dim (PyTorch semantics).
    mu = jnp.mean(x, axis=-1, keepdims=True)
    xc = x - mu
    var = jnp.mean(xc * xc, axis=-1, keepdims=True)
    return xc * lax.rsqrt(var + LN_EPS) * gamma + beta


def _mha(q_scaled, get_kv, S, num_heads, kv_tile, cdt, approx_recip):
    """Multi-head attention core.

    q_scaled: (St, E) f32, already scaled by 1/sqrt(hd).
    get_kv(lo, size) -> (k_chunk, v_chunk) each (size, E) in compute dtype `cdt`.
    Returns (St, E) f32.
    """
    St, E = q_scaled.shape
    hd = E // num_heads
    q_c = q_scaled.astype(cdt)              # cast once, hoisted out of the head loop
    n_kv = S // kv_tile

    def recip(x):
        return pl.reciprocal(x, approx=True) if approx_recip else 1.0 / x

    def scores(qh, kh):
        # contract last dims directly -- no explicit kh.T (no XLU transpose)
        return lax.dot_general(qh, kh, (((1,), (1,)), ((), ())),
                               preferred_element_type=jnp.float32)

    # TODO(synk): replace the static per-head loop with one (H, St, hd) batched
    #             dot_general to avoid sub-128-lane head slices on v6e/v7x.
    if n_kv == 1:
        k_c, v_c = get_kv(0, S)
        outs = []
        for h in range(num_heads):
            sl = slice(h * hd, (h + 1) * hd)
            s = scores(q_c[:, sl], k_c[:, sl])                       # (St, S)
            s = s - jnp.max(s, axis=-1, keepdims=True)
            p = jnp.exp(s)
            p = p * recip(jnp.sum(p, axis=-1, keepdims=True))
            outs.append(jnp.dot(p.astype(cdt), v_c[:, sl],
                                preferred_element_type=jnp.float32))  # (St, hd)
    else:
        # Flash-style online softmax over KV tiles: never materializes (St, S).
        ms = [jnp.full((St, 1), -jnp.inf, jnp.float32) for _ in range(num_heads)]
        ls = [jnp.zeros((St, 1), jnp.float32) for _ in range(num_heads)]
        accs = [jnp.zeros((St, hd), jnp.float32) for _ in range(num_heads)]
        for j in range(n_kv):
            k_c, v_c = get_kv(j * kv_tile, kv_tile)                  # (kv_tile, E)
            for h in range(num_heads):
                sl = slice(h * hd, (h + 1) * hd)
                s = scores(q_c[:, sl], k_c[:, sl])                   # (St, kv_tile)
                m_new = jnp.maximum(ms[h], jnp.max(s, axis=-1, keepdims=True))
                alpha = jnp.exp(ms[h] - m_new)
                p = jnp.exp(s - m_new)
                ls[h] = alpha * ls[h] + jnp.sum(p, axis=-1, keepdims=True)
                accs[h] = alpha * accs[h] + jnp.dot(
                    p.astype(cdt), v_c[:, sl], preferred_element_type=jnp.float32)
                ms[h] = m_new
        outs = [accs[h] * recip(ls[h]) for h in range(num_heads)]

    return jnp.concatenate(outs, axis=-1) if num_heads > 1 else outs[0]


def _proj_ffn_ln(x_resid, attn, wo_ref, w1_ref, w2_ref, c, ffn_chunk, cdt):
    """Output projection + residual/LN1 + chunked FFN + residual/LN2. Returns (St, E) f32."""
    H4 = w1_ref.shape[1]
    attn_out = (jnp.dot(attn.astype(cdt), wo_ref[...],
                        preferred_element_type=jnp.float32) + c["bo"])
    y1 = _layernorm(x_resid + attn_out, c["g1"], c["b1"])

    y1_c = y1.astype(cdt)
    ff = None
    # chunk the 4E hidden dim so the (St, 4E) activation is never fully live
    for lo in range(0, H4, ffn_chunk):
        hc = (jnp.dot(y1_c, w1_ref[:, lo:lo + ffn_chunk],
                      preferred_element_type=jnp.float32)
              + c["bf1"][:, lo:lo + ffn_chunk])
        hc = jnp.maximum(hc, 0.0)
        part = jnp.dot(hc.astype(cdt), w2_ref[lo:lo + ffn_chunk, :],
                       preferred_element_type=jnp.float32)
        ff = part if ff is None else ff + part
    ff = ff + c["bf2"]

    return _layernorm(y1 + ff, c["g2"], c["b2"])


# ----------------------------------------------------------------------------- kernels

def _attention_block_kernel_full(x_ref, wqkv_ref, wo_ref, w1_ref, w2_ref,
                                 consts_ref, o_ref, *, num_heads, kv_tile,
                                 ffn_chunk, layout, approx_recip):
    """q_tile == S path: single input, fully fused QKV projection."""
    _, S, E = x_ref.shape
    hd = E // num_heads
    scale = 1.0 / math.sqrt(hd)
    cdt = wqkv_ref.dtype
    c = _unpack_consts(consts_ref, layout)

    x = x_ref[0].astype(jnp.float32)                       # (S, E) residual path in f32
    qkv = (jnp.dot(x.astype(cdt), wqkv_ref[...],
                   preferred_element_type=jnp.float32) + c["b_qkv"])
    q = qkv[:, :E] * scale                                 # softmax scale hoisted
    k_c = qkv[:, E:2 * E].astype(cdt)                      # cast once (hoisted)
    v_c = qkv[:, 2 * E:].astype(cdt)

    def get_kv(lo, size):
        return k_c[lo:lo + size, :], v_c[lo:lo + size, :]

    attn = _mha(q, get_kv, S, num_heads, kv_tile, cdt, approx_recip)
    y2 = _proj_ffn_ln(x, attn, wo_ref, w1_ref, w2_ref, c, ffn_chunk, cdt)
    o_ref[0] = y2.astype(o_ref.dtype)


def _attention_block_kernel_tiled(xq_ref, xkv_ref, wq_ref, wkv_ref, wo_ref,
                                  w1_ref, w2_ref, consts_ref, o_ref,
                                  k_sc=None, v_sc=None, *, num_heads, kv_tile,
                                  ffn_chunk, layout, approx_recip):
    """q_tile < S path: query-row tiles; K/V from the full sequence.

    If VMEM scratch (k_sc/v_sc) is provided, K/V are projected once per batch row
    (at program_id(1)==0, q-axis "arbitrary") and reused for every q-tile.
    Otherwise they are recomputed per tile (q-axis stays "parallel" -> megacore).
    """
    _, St, E = xq_ref.shape
    S = xkv_ref.shape[1]
    hd = E // num_heads
    scale = 1.0 / math.sqrt(hd)
    cdt = wq_ref.dtype
    c = _unpack_consts(consts_ref, layout)

    if k_sc is None:
        kv = (jnp.dot(xkv_ref[0], wkv_ref[...],
                      preferred_element_type=jnp.float32) + c["b_kv"])
        k_full = kv[:, :E].astype(cdt)
        v_full = kv[:, E:].astype(cdt)

        def get_kv(lo, size):
            return k_full[lo:lo + size, :], v_full[lo:lo + size, :]
    else:
        @pl.when(pl.program_id(1) == 0)
        def _():
            kv = (jnp.dot(xkv_ref[0], wkv_ref[...],
                          preferred_element_type=jnp.float32) + c["b_kv"])
            k_sc[...] = kv[:, :E].astype(cdt)
            v_sc[...] = kv[:, E:].astype(cdt)

        def get_kv(lo, size):
            return k_sc[lo:lo + size, :], v_sc[lo:lo + size, :]

    xq = xq_ref[0].astype(jnp.float32)                     # (St, E) residual in f32
    q = (jnp.dot(xq.astype(cdt), wq_ref[...],
                 preferred_element_type=jnp.float32) + c["b_q"]) * scale

    attn = _mha(q, get_kv, S, num_heads, kv_tile, cdt, approx_recip)
    y2 = _proj_ffn_ln(xq, attn, wo_ref, w1_ref, w2_ref, c, ffn_chunk, cdt)
    o_ref[0] = y2.astype(o_ref.dtype)


# ----------------------------------------------------------------------------- wrapper

def attention_block(x, params, num_heads, *, q_tile=None, kv_tile=None,
                    ffn_chunk=None, persist_kv=None,
                    compute_dtype=jnp.bfloat16, approx_softmax_recip=True,
                    vmem_limit_bytes=48 * 1024 * 1024):
    B, S, E = x.shape
    H4 = 4 * E
    assert E % num_heads == 0

    # --- tiling choices -------------------------------------------------------
    if q_tile is None:
        q_tile = S
        # v7x megacore: with B == 1 and large S, split the q axis so both
        # TensorCores get work (uses the recompute-K/V variant below).
        if B == 1 and S >= 512 and S % 2 == 0 and (S // 2) % 8 == 0:
            q_tile = S // 2
    assert S % q_tile == 0
    nq = S // q_tile
    full_seq = q_tile == S

    if kv_tile is None:
        kv_tile = S if S <= 1024 else 512
    if kv_tile > S or S % kv_tile != 0:
        kv_tile = S

    if ffn_chunk is None:
        ffn_chunk = H4 if H4 <= 2048 else 2048
    if ffn_chunk > H4 or H4 % ffn_chunk != 0:
        ffn_chunk = H4

    if persist_kv is None:
        # Share K/V across q-tiles (q-axis "arbitrary") only when the batch axis
        # alone already exposes >= 2 parallel grid cells for megacore.
        persist_kv = B >= 2

    cdt = compute_dtype
    f32 = jnp.float32

    wo = params["wo"].astype(cdt)
    w1 = params["ff_w1"].astype(cdt)
    w2 = params["ff_w2"].astype(cdt)

    # Constant-index blocks never change -> single buffer (half the weight VMEM).
    def const_spec(shape):
        imap = lambda b, i: (0,) * len(shape)
        try:
            return pl.BlockSpec(shape, imap, pipeline_mode=pl.Buffered(1))
        except TypeError:   # older jax without pipeline_mode: fall back to default
            return pl.BlockSpec(shape, imap)

    common_consts = [
        ("bo", params["bo"]),
        ("g1", params["ln1_g"]), ("b1", params["ln1_b"]),
        ("bf1", params["ff_b1"]), ("bf2", params["ff_b2"]),
        ("g2", params["ln2_g"]), ("b2", params["ln2_b"]),
    ]

    cp_kwargs = dict(vmem_limit_bytes=vmem_limit_bytes)

    if full_seq:
        # fused (E, 3E) QKV projection; no duplicate xkv input on this path
        w_qkv = jnp.concatenate([params["wq"], params["wk"], params["wv"]],
                                axis=1).astype(cdt)
        b_qkv = jnp.concatenate([params["bq"], params["bk"], params["bv"]], axis=1)
        consts, layout = _pack_consts([("b_qkv", b_qkv)] + common_consts)

        kernel = functools.partial(
            _attention_block_kernel_full, num_heads=num_heads, kv_tile=kv_tile,
            ffn_chunk=ffn_chunk, layout=layout, approx_recip=approx_softmax_recip)

        in_specs = [
            pl.BlockSpec((1, q_tile, E), lambda b, i: (b, i, 0)),   # x (f32)
            const_spec((E, 3 * E)),                                 # fused QKV weights
            const_spec((E, E)),                                     # wo
            const_spec((E, H4)),                                    # ff w1
            const_spec((H4, E)),                                    # ff w2
            const_spec((1, consts.shape[1])),                       # packed biases/LN
        ]
        args = (x, w_qkv, wo, w1, w2, consts)
        scratch_shapes = ()
        cp_kwargs["dimension_semantics"] = ("parallel", "parallel")
    else:
        w_q = params["wq"].astype(cdt)                                        # (E, E)
        w_kv = jnp.concatenate([params["wk"], params["wv"]], axis=1).astype(cdt)  # (E, 2E)
        b_kv = jnp.concatenate([params["bk"], params["bv"]], axis=1)
        consts, layout = _pack_consts(
            [("b_q", params["bq"]), ("b_kv", b_kv)] + common_consts)

        kernel = functools.partial(
            _attention_block_kernel_tiled, num_heads=num_heads, kv_tile=kv_tile,
            ffn_chunk=ffn_chunk, layout=layout, approx_recip=approx_softmax_recip)

        in_specs = [
            pl.BlockSpec((1, q_tile, E), lambda b, i: (b, i, 0)),   # query-row tile (f32)
            pl.BlockSpec((1, S, E), lambda b, i: (b, 0, 0)),        # full seq, compute dtype
            const_spec((E, E)),                                     # w_q
            const_spec((E, 2 * E)),                                 # w_kv
            const_spec((E, E)),                                     # wo
            const_spec((E, H4)),                                    # ff w1
            const_spec((H4, E)),                                    # ff w2
            const_spec((1, consts.shape[1])),                       # packed biases/LN
        ]
        args = (x, x.astype(cdt), w_q, w_kv, wo, w1, w2, consts)
        if persist_kv:
            scratch_shapes = (pltpu.VMEM((S, E), cdt), pltpu.VMEM((S, E), cdt))
            # q axis must run in order so the i==0 step can populate the K/V scratch
            cp_kwargs["dimension_semantics"] = ("parallel", "arbitrary")
        else:
            scratch_shapes = ()
            cp_kwargs["dimension_semantics"] = ("parallel", "parallel")

    return pl.pallas_call(
        kernel,
        out_shape=jax.ShapeDtypeStruct((B, S, E), x.dtype),
        grid=(B, nq),
        in_specs=in_specs,
        out_specs=pl.BlockSpec((1, q_tile, E), lambda b, i: (b, i, 0)),
        scratch_shapes=scratch_shapes,
        compiler_params=pltpu.CompilerParams(**cp_kwargs),
    )(*args)


# ----------------------------------------------------------------------------- params / reference

def init_params(key, embed_dim):
    E, H4 = embed_dim, 4 * embed_dim
    ks = jax.random.split(key, 8)
    scale_e = 1.0 / math.sqrt(E)
    scale_h = 1.0 / math.sqrt(H4)
    f32 = jnp.float32
    return {
        "wq": jax.random.normal(ks[0], (E, E), f32) * scale_e,
        "wk": jax.random.normal(ks[1], (E, E), f32) * scale_e,
        "wv": jax.random.normal(ks[2], (E, E), f32) * scale_e,
        "bq": jax.random.normal(ks[3], (1, E), f32) * 0.01,
        "bk": jnp.zeros((1, E), f32),
        "bv": jnp.zeros((1, E), f32),
        "wo": jax.random.normal(ks[4], (E, E), f32) * scale_e,
        "bo": jnp.zeros((1, E), f32),
        "ln1_g": jnp.ones((1, E), f32),
        "ln1_b": jnp.zeros((1, E), f32),
        "ff_w1": jax.random.normal(ks[5], (E, H4), f32) * scale_e,
        "ff_b1": jax.random.normal(ks[6], (1, H4), f32) * 0.01,
        "ff_w2": jax.random.normal(ks[7], (H4, E), f32) * scale_h,
        "ff_b2": jnp.zeros((1, E), f32),
        "ln2_g": jnp.ones((1, E), f32),
        "ln2_b": jnp.zeros((1, E), f32),
    }


def reference_attention_block(x, params, num_heads):
    """Pure-JAX reference mirroring PyTorch nn.MultiheadAttention + block (eval mode)."""
    B, S, E = x.shape
    hd = E // num_heads
    q = x @ params["wq"] + params["bq"]
    k = x @ params["wk"] + params["bk"]
    v = x @ params["wv"] + params["bv"]
    q = q.reshape(B, S, num_heads, hd).transpose(0, 2, 1, 3) / math.sqrt(hd)
    k = k.reshape(B, S, num_heads, hd).transpose(0, 2, 1, 3)
    v = v.reshape(B, S, num_heads, hd).transpose(0, 2, 1, 3)
    s = jnp.einsum("bhqd,bhkd->bhqk", q, k)
    p = jax.nn.softmax(s, axis=-1)
    o = jnp.einsum("bhqk,bhkd->bhqd", p, v).transpose(0, 2, 1, 3).reshape(B, S, E)
    attn = o @ params["wo"] + params["bo"]

    def ln(t, g, b):
        mu = jnp.mean(t, -1, keepdims=True)
        var = jnp.mean((t - mu) ** 2, -1, keepdims=True)
        return (t - mu) / jnp.sqrt(var + LN_EPS) * g + b

    y1 = ln(x + attn, params["ln1_g"], params["ln1_b"])
    ff = jnp.maximum(y1 @ params["ff_w1"] + params["ff_b1"], 0.0) @ params["ff_w2"] + params["ff_b2"]
    return ln(y1 + ff, params["ln2_g"], params["ln2_b"])


# ----------------------------------------------------------------------------- smoke test

if __name__ == "__main__":
    B, S, E, H = 2, 8, 32, 4

    key = jax.random.PRNGKey(0)
    k_x, k_x2, k_p = jax.random.split(key, 3)
    x = jax.random.normal(k_x, (B, S, E), jnp.float32)
    params = init_params(k_p, E)
    ref = reference_attention_block(x, params, num_heads=H)

    # 1) default fused path (q_tile == S), f32 MXU, exact softmax reciprocal.
    out = jax.block_until_ready(attention_block(
        x, params, num_heads=H, compute_dtype=jnp.float32,
        approx_softmax_recip=False))
    assert out.shape == (B, S, E)
    assert jnp.allclose(out, ref, atol=2e-2, rtol=2e-2), "f32 full path mismatch"

    # 2) default bf16 MXU path (f32 accumulation / LN / softmax) -- looser tol.
    out_bf16 = jax.block_until_ready(attention_block(x, params, num_heads=H))
    assert out_bf16.shape == (B, S, E)
    assert jnp.allclose(out_bf16, ref, atol=1e-1, rtol=1e-1), "bf16 path mismatch"

    # 3) flash-style online-softmax KV tiling inside the full-seq kernel.
    B2, S2 = 2, 16
    x2 = jax.random.normal(k_x2, (B2, S2, E), jnp.float32)
    ref2 = reference_attention_block(x2, params, num_heads=H)
    out_flash = jax.block_until_ready(attention_block(
        x2, params, num_heads=H, kv_tile=8, compute_dtype=jnp.float32,
        approx_softmax_recip=False))
    assert jnp.allclose(out_flash, ref2, atol=2e-2, rtol=2e-2), "flash path mismatch"

    # 4) q-tiled path with persistent K/V VMEM scratch (q axis "arbitrary").
    out_tiled = jax.block_until_ready(attention_block(
        x2, params, num_heads=H, q_tile=8, kv_tile=8,
        compute_dtype=jnp.float32, approx_softmax_recip=False))
    assert jnp.allclose(out_tiled, ref2, atol=2e-2, rtol=2e-2), "tiled (scratch) mismatch"

    # 5) q-tiled path with B == 1: recompute-K/V variant, q axis stays "parallel".
    x3 = x2[:1]
    ref3 = reference_attention_block(x3, params, num_heads=H)
    out_par = jax.block_until_ready(attention_block(
        x3, params, num_heads=H, q_tile=8, kv_tile=8,
        compute_dtype=jnp.float32, approx_softmax_recip=False))
    assert jnp.allclose(out_par, ref3, atol=2e-2, rtol=2e-2), "tiled (parallel) mismatch"

    print("KERNEL_OK")
</pallas_src>

<mosaic_0001>
module attributes {stable_mosaic.version = 11 : i64} {
  func.func @_attention_block_kernel_full(%arg0: i32, %arg1: i32, %arg2: memref<1x8x32xf32, #tpu.memory_space<vmem>>, %arg3: memref<32x96xf32, #tpu.memory_space<vmem>>, %arg4: memref<32x32xf32, #tpu.memory_space<vmem>>, %arg5: memref<32x128xf32, #tpu.memory_space<vmem>>, %arg6: memref<128x32xf32, #tpu.memory_space<vmem>>, %arg7: memref<1x1024xf32, #tpu.memory_space<vmem>>, %arg8: memref<1x8x32xf32, #tpu.memory_space<vmem>>) attributes {dimension_semantics = [#tpu.dimension_semantics<parallel>, #tpu.dimension_semantics<parallel>], iteration_bounds = array<i64: 2, 1>, scalar_prefetch = 0 : i64, scratch_operands = 0 : i64, tpu.core_type = #tpu.core_type<tc>, window_params = [{transform_indices = @transform_0, window_bounds = array<i64: 1, 8, 32>}, {pipeline_mode = #tpu.pipeline_mode<synchronous>, transform_indices = @transform_1, window_bounds = array<i64: 32, 96>}, {pipeline_mode = #tpu.pipeline_mode<synchronous>, transform_indices = @transform_2, window_bounds = array<i64: 32, 32>}, {pipeline_mode = #tpu.pipeline_mode<synchronous>, transform_indices = @transform_3, window_bounds = array<i64: 32, 128>}, {pipeline_mode = #tpu.pipeline_mode<synchronous>, transform_indices = @transform_4, window_bounds = array<i64: 128, 32>}, {pipeline_mode = #tpu.pipeline_mode<synchronous>, transform_indices = @transform_5, window_bounds = array<i64: 1, 1024>}, {transform_indices = @transform_6, window_bounds = array<i64: 1, 8, 32>}]} {
    %c0 = arith.constant 0 : index
    %c0_0 = arith.constant 0 : index
    %0 = vector.load %arg7[%c0, %c0_0] : memref<1x1024xf32, #tpu.memory_space<vmem>>, vector<1x96xf32>
    %c0_1 = arith.constant 0 : index
    %c128 = arith.constant 128 : index
    %1 = vector.load %arg7[%c0_1, %c128] : memref<1x1024xf32, #tpu.memory_space<vmem>>, vector<1x32xf32>
    %c0_2 = arith.constant 0 : index
    %c256 = arith.constant 256 : index
    %2 = vector.load %arg7[%c0_2, %c256] : memref<1x1024xf32, #tpu.memory_space<vmem>>, vector<1x32xf32>
    %c0_3 = arith.constant 0 : index
    %c384 = arith.constant 384 : index
    %3 = vector.load %arg7[%c0_3, %c384] : memref<1x1024xf32, #tpu.memory_space<vmem>>, vector<1x32xf32>
    %c0_4 = arith.constant 0 : index
    %c512 = arith.constant 512 : index
    %4 = vector.load %arg7[%c0_4, %c512] : memref<1x1024xf32, #tpu.memory_space<vmem>>, vector<1x128xf32>
    %c0_5 = arith.constant 0 : index
    %c640 = arith.constant 640 : index
    %5 = vector.load %arg7[%c0_5, %c640] : memref<1x1024xf32, #tpu.memory_space<vmem>>, vector<1x32xf32>
    %c0_6 = arith.constant 0 : index
    %c768 = arith.constant 768 : index
    %6 = vector.load %arg7[%c0_6, %c768] : memref<1x1024xf32, #tpu.memory_space<vmem>>, vector<1x32xf32>
    %c0_7 = arith.constant 0 : index
    %c896 = arith.constant 896 : index
    %7 = vector.load %arg7[%c0_7, %c896] : memref<1x1024xf32, #tpu.memory_space<vmem>>, vector<1x32xf32>
    %c0_8 = arith.constant 0 : index
    %c0_9 = arith.constant 0 : index
    %c0_10 = arith.constant 0 : index
    %8 = vector.load %arg2[%c0_8, %c0_9, %c0_10] : memref<1x8x32xf32, #tpu.memory_space<vmem>>, vector<1x8x32xf32>
    %9 = vector.shape_cast %8 : vector<1x8x32xf32> to vector<8x32xf32>
    %c0_11 = arith.constant 0 : index
    %c0_12 = arith.constant 0 : index
    %10 = vector.load %arg3[%c0_11, %c0_12] : memref<32x96xf32, #tpu.memory_space<vmem>>, vector<32x96xf32>
    %cst = arith.constant dense<0.000000e+00> : vector<8x96xf32>
    %11 = tpu.matmul %9, %10, %cst {dimension_numbers = #tpu.dot_dimension_numbers<[1], [0], [0], [1], [0, 0, 1, 1], [], []>} : vector<8x32xf32>, vector<32x96xf32>, vector<8x96xf32> -> vector<8x96xf32>
    %12 = vector.broadcast %0 : vector<1x96xf32> to vector<8x96xf32>
    %13 = arith.addf %11, %12 : vector<8x96xf32>
    %14 = vector.extract_strided_slice %13 {offsets = [0, 0], sizes = [8, 32], strides = [1, 1]} : vector<8x96xf32> to vector<8x32xf32>
    %cst_13 = arith.constant 0.353553385 : f32
    %15 = vector.broadcast %cst_13 : f32 to vector<8x32xf32>
    %16 = arith.mulf %14, %15 : vector<8x32xf32>
    %17 = vector.extract_strided_slice %13 {offsets = [0, 32], sizes = [8, 32], strides = [1, 1]} : vector<8x96xf32> to vector<8x32xf32>
    %18 = vector.extract_strided_slice %13 {offsets = [0, 64], sizes = [8, 32], strides = [1, 1]} : vector<8x96xf32> to vector<8x32xf32>
    %19 = vector.extract_strided_slice %16 {offsets = [0, 0], sizes = [8, 8], strides = [1, 1]} : vector<8x32xf32> to vector<8x8xf32>
    %20 = vector.extract_strided_slice %17 {offsets = [0, 0], sizes = [8, 8], strides = [1, 1]} : vector<8x32xf32> to vector<8x8xf32>
    %cst_14 = arith.constant dense<0.000000e+00> : vector<8x8xf32>
    %21 = tpu.matmul %19, %20, %cst_14 {dimension_numbers = #tpu.dot_dimension_numbers<[1], [1], [0], [0], [0, 0, 1, 0], [], []>} : vector<8x8xf32>, vector<8x8xf32>, vector<8x8xf32> -> vector<8x8xf32>
    %cst_15 = arith.constant dense<0xFF800000> : vector<8xf32>
    %22 = vector.multi_reduction <maximumf>, %21, %cst_15 [1] : vector<8x8xf32> to vector<8xf32>
    %23 = vector.shape_cast %22 : vector<8xf32> to vector<8x1xf32>
    %24 = vector.broadcast %23 : vector<8x1xf32> to vector<8x8xf32>
    %25 = arith.subf %21, %24 : vector<8x8xf32>
    %26 = math.exp %25 : vector<8x8xf32>
    %cst_16 = arith.constant dense<0.000000e+00> : vector<8xf32>
    %27 = vector.multi_reduction <add>, %26, %cst_16 [1] : vector<8x8xf32> to vector<8xf32>
    %28 = vector.shape_cast %27 : vector<8xf32> to vector<8x1xf32>
    %cst_17 = arith.constant 1.000000e+00 : f32
    %29 = vector.broadcast %cst_17 : f32 to vector<8x1xf32>
    %30 = arith.divf %29, %28 : vector<8x1xf32>
    %31 = vector.broadcast %30 : vector<8x1xf32> to vector<8x8xf32>
    %32 = arith.mulf %26, %31 : vector<8x8xf32>
    %33 = vector.extract_strided_slice %18 {offsets = [0, 0], sizes = [8, 8], strides = [1, 1]} : vector<8x32xf32> to vector<8x8xf32>
    %cst_18 = arith.constant dense<0.000000e+00> : vector<8x8xf32>
    %34 = tpu.matmul %32, %33, %cst_18 {dimension_numbers = #tpu.dot_dimension_numbers<[1], [0], [0], [1], [0, 0, 1, 1], [], []>} : vector<8x8xf32>, vector<8x8xf32>, vector<8x8xf32> -> vector<8x8xf32>
    %35 = vector.extract_strided_slice %16 {offsets = [0, 8], sizes = [8, 8], strides = [1, 1]} : vector<8x32xf32> to vector<8x8xf32>
    %36 = vector.extract_strided_slice %17 {offsets = [0, 8], sizes = [8, 8], strides = [1, 1]} : vector<8x32xf32> to vector<8x8xf32>
    %cst_19 = arith.constant dense<0.000000e+00> : vector<8x8xf32>
    %37 = tpu.matmul %35, %36, %cst_19 {dimension_numbers = #tpu.dot_dimension_numbers<[1], [1], [0], [0], [0, 0, 1, 0], [], []>} : vector<8x8xf32>, vector<8x8xf32>, vector<8x8xf32> -> vector<8x8xf32>
    %cst_20 = arith.constant dense<0xFF800000> : vector<8xf32>
    %38 = vector.multi_reduction <maximumf>, %37, %cst_20 [1] : vector<8x8xf32> to vector<8xf32>
    %39 = vector.shape_cast %38 : vector<8xf32> to vector<8x1xf32>
    %40 = vector.broadcast %39 : vector<8x1xf32> to vector<8x8xf32>
    %41 = arith.subf %37, %40 : vector<8x8xf32>
    %42 = math.exp %41 : vector<8x8xf32>
    %cst_21 = arith.constant dense<0.000000e+00> : vector<8xf32>
    %43 = vector.multi_reduction <add>, %42, %cst_21 [1] : vector<8x8xf32> to vector<8xf32>
    %44 = vector.shape_cast %43 : vector<8xf32> to vector<8x1xf32>
    %cst_22 = arith.constant 1.000000e+00 : f32
    %45 = vector.broadcast %cst_22 : f32 to vector<8x1xf32>
    %46 = arith.divf %45, %44 : vector<8x1xf32>
    %47 = vector.broadcast %46 : vector<8x1xf32> to vector<8x8xf32>
    %48 = arith.mulf %42, %47 : vector<8x8xf32>
    %49 = vector.extract_strided_slice %18 {offsets = [0, 8], sizes = [8, 8], strides = [1, 1]} : vector<8x32xf32> to vector<8x8xf32>
    %cst_23 = arith.constant dense<0.000000e+00> : vector<8x8xf32>
    %50 = tpu.matmul %48, %49, %cst_23 {dimension_numbers = #tpu.dot_dimension_numbers<[1], [0], [0], [1], [0, 0, 1, 1], [], []>} : vector<8x8xf32>, vector<8x8xf32>, vector<8x8xf32> -> vector<8x8xf32>
    %51 = vector.extract_strided_slice %16 {offsets = [0, 16], sizes = [8, 8], strides = [1, 1]} : vector<8x32xf32> to vector<8x8xf32>
    %52 = vector.extract_strided_slice %17 {offsets = [0, 16], sizes = [8, 8], strides = [1, 1]} : vector<8x32xf32> to vector<8x8xf32>
    %cst_24 = arith.constant dense<0.000000e+00> : vector<8x8xf32>
    %53 = tpu.matmul %51, %52, %cst_24 {dimension_numbers = #tpu.dot_dimension_numbers<[1], [1], [0], [0], [0, 0, 1, 0], [], []>} : vector<8x8xf32>, vector<8x8xf32>, vector<8x8xf32> -> vector<8x8xf32>
    %cst_25 = arith.constant dense<0xFF800000> : vector<8xf32>
    %54 = vector.multi_reduction <maximumf>, %53, %cst_25 [1] : vector<8x8xf32> to vector<8xf32>
    %55 = vector.shape_cast %54 : vector<8xf32> to vector<8x1xf32>
    %56 = vector.broadcast %55 : vector<8x1xf32> to vector<8x8xf32>
    %57 = arith.subf %53, %56 : vector<8x8xf32>
    %58 = math.exp %57 : vector<8x8xf32>
    %cst_26 = arith.constant dense<0.000000e+00> : vector<8xf32>
    %59 = vector.multi_reduction <add>, %58, %cst_26 [1] : vector<8x8xf32> to vector<8xf32>
    %60 = vector.shape_cast %59 : vector<8xf32> to vector<8x1xf32>
    %cst_27 = arith.constant 1.000000e+00 : f32
    %61 = vector.broadcast %cst_27 : f32 to vector<8x1xf32>
    %62 = arith.divf %61, %60 : vector<8x1xf32>
    %63 = vector.broadcast %62 : vector<8x1xf32> to vector<8x8xf32>
    %64 = arith.mulf %58, %63 : vector<8x8xf32>
    %65 = vector.extract_strided_slice %18 {offsets = [0, 16], sizes = [8, 8], strides = [1, 1]} : vector<8x32xf32> to vector<8x8xf32>
    %cst_28 = arith.constant dense<0.000000e+00> : vector<8x8xf32>
    %66 = tpu.matmul %64, %65, %cst_28 {dimension_numbers = #tpu.dot_dimension_numbers<[1], [0], [0], [1], [0, 0, 1, 1], [], []>} : vector<8x8xf32>, vector<8x8xf32>, vector<8x8xf32> -> vector<8x8xf32>
    %67 = vector.extract_strided_slice %16 {offsets = [0, 24], sizes = [8, 8], strides = [1, 1]} : vector<8x32xf32> to vector<8x8xf32>
    %68 = vector.extract_strided_slice %17 {offsets = [0, 24], sizes = [8, 8], strides = [1, 1]} : vector<8x32xf32> to vector<8x8xf32>
    %cst_29 = arith.constant dense<0.000000e+00> : vector<8x8xf32>
    %69 = tpu.matmul %67, %68, %cst_29 {dimension_numbers = #tpu.dot_dimension_numbers<[1], [1], [0], [0], [0, 0, 1, 0], [], []>} : vector<8x8xf32>, vector<8x8xf32>, vector<8x8xf32> -> vector<8x8xf32>
    %cst_30 = arith.constant dense<0xFF800000> : vector<8xf32>
    %70 = vector.multi_reduction <maximumf>, %69, %cst_30 [1] : vector<8x8xf32> to vector<8xf32>
    %71 = vector.shape_cast %70 : vector<8xf32> to vector<8x1xf32>
    %72 = vector.broadcast %71 : vector<8x1xf32> to vector<8x8xf32>
    %73 = arith.subf %69, %72 : vector<8x8xf32>
    %74 = math.exp %73 : vector<8x8xf32>
    %cst_31 = arith.constant dense<0.000000e+00> : vector<8xf32>
    %75 = vector.multi_reduction <add>, %74, %cst_31 [1] : vector<8x8xf32> to vector<8xf32>
    %76 = vector.shape_cast %75 : vector<8xf32> to vector<8x1xf32>
    %cst_32 = arith.constant 1.000000e+00 : f32
    %77 = vector.broadcast %cst_32 : f32 to vector<8x1xf32>
    %78 = arith.divf %77, %76 : vector<8x1xf32>
    %79 = vector.broadcast %78 : vector<8x1xf32> to vector<8x8xf32>
    %80 = arith.mulf %74, %79 : vector<8x8xf32>
    %81 = vector.extract_strided_slice %18 {offsets = [0, 24], sizes = [8, 8], strides = [1, 1]} : vector<8x32xf32> to vector<8x8xf32>
    %cst_33 = arith.constant dense<0.000000e+00> : vector<8x8xf32>
    %82 = tpu.matmul %80, %81, %cst_33 {dimension_numbers = #tpu.dot_dimension_numbers<[1], [0], [0], [1], [0, 0, 1, 1], [], []>} : vector<8x8xf32>, vector<8x8xf32>, vector<8x8xf32> -> vector<8x8xf32>
    %83 = tpu.concatenate %34, %50, %66, %82 in 1 : vector<8x8xf32>, vector<8x8xf32>, vector<8x8xf32>, vector<8x8xf32> -> vector<8x32xf32>
    %c0_34 = arith.constant 0 : index
    %c0_35 = arith.constant 0 : index
    %84 = vector.load %arg4[%c0_34, %c0_35] : memref<32x32xf32, #tpu.memory_space<vmem>>, vector<32x32xf32>
    %cst_36 = arith.constant dense<0.000000e+00> : vector<8x32xf32>
    %85 = tpu.matmul %83, %84, %cst_36 {dimension_numbers = #tpu.dot_dimension_numbers<[1], [0], [0], [1], [0, 0, 1, 1], [], []>} : vector<8x32xf32>, vector<32x32xf32>, vector<8x32xf32> -> vector<8x32xf32>
    %86 = vector.broadcast %1 : vector<1x32xf32> to vector<8x32xf32>
    %87 = arith.addf %85, %86 : vector<8x32xf32>
    %88 = arith.addf %9, %87 : vector<8x32xf32>
    %cst_37 = arith.constant dense<0.000000e+00> : vector<8xf32>
    %89 = vector.multi_reduction <add>, %88, %cst_37 [1] : vector<8x32xf32> to vector<8xf32>
    %90 = vector.shape_cast %89 : vector<8xf32> to vector<8x1xf32>
    %cst_38 = arith.constant 3.200000e+01 : f32
    %91 = vector.broadcast %cst_38 : f32 to vector<8x1xf32>
    %92 = arith.divf %90, %91 : vector<8x1xf32>
    %93 = vector.broadcast %92 : vector<8x1xf32> to vector<8x32xf32>
    %94 = arith.subf %88, %93 : vector<8x32xf32>
    %95 = arith.mulf %94, %94 : vector<8x32xf32>
    %cst_39 = arith.constant dense<0.000000e+00> : vector<8xf32>
    %96 = vector.multi_reduction <add>, %95, %cst_39 [1] : vector<8x32xf32> to vector<8xf32>
    %97 = vector.shape_cast %96 : vector<8xf32> to vector<8x1xf32>
    %cst_40 = arith.constant 3.200000e+01 : f32
    %98 = vector.broadcast %cst_40 : f32 to vector<8x1xf32>
    %99 = arith.divf %97, %98 : vector<8x1xf32>
    %cst_41 = arith.constant 9.99999974E-6 : f32
    %100 = vector.broadcast %cst_41 : f32 to vector<8x1xf32>
    %101 = arith.addf %99, %100 : vector<8x1xf32>
    %102 = math.rsqrt %101 : vector<8x1xf32>
    %103 = vector.broadcast %102 : vector<8x1xf32> to vector<8x32xf32>
    %104 = arith.mulf %94, %103 : vector<8x32xf32>
    %105 = vector.broadcast %2 : vector<1x32xf32> to vector<8x32xf32>
    %106 = arith.mulf %104, %105 : vector<8x32xf32>
    %107 = vector.broadcast %3 : vector<1x32xf32> to vector<8x32xf32>
    %108 = arith.addf %106, %107 : vector<8x32xf32>
    %c0_42 = arith.constant 0 : index
    %c0_43 = arith.constant 0 : index
    %109 = vector.load %arg5[%c0_42, %c0_43] : memref<32x128xf32, #tpu.memory_space<vmem>>, vector<32x128xf32>
    %cst_44 = arith.constant dense<0.000000e+00> : vector<8x128xf32>
    %110 = tpu.matmul %108, %109, %cst_44 {dimension_numbers = #tpu.dot_dimension_numbers<[1], [0], [0], [1], [0, 0, 1, 1], [], []>} : vector<8x32xf32>, vector<32x128xf32>, vector<8x128xf32> -> vector<8x128xf32>
    %111 = vector.broadcast %4 : vector<1x128xf32> to vector<8x128xf32>
    %112 = arith.addf %110, %111 : vector<8x128xf32>
    %cst_45 = arith.constant 0.000000e+00 : f32
    %113 = vector.broadcast %cst_45 : f32 to vector<8x128xf32>
    %114 = arith.maximumf %112, %113 : vector<8x128xf32>
    %c0_46 = arith.constant 0 : index
    %c0_47 = arith.constant 0 : index
    %115 = vector.load %arg6[%c0_46, %c0_47] : memref<128x32xf32, #tpu.memory_space<vmem>>, vector<128x32xf32>
    %cst_48 = arith.constant dense<0.000000e+00> : vector<8x32xf32>
    %116 = tpu.matmul %114, %115, %cst_48 {dimension_numbers = #tpu.dot_dimension_numbers<[1], [0], [0], [1], [0, 0, 1, 1], [], []>} : vector<8x128xf32>, vector<128x32xf32>, vector<8x32xf32> -> vector<8x32xf32>
    %117 = vector.broadcast %5 : vector<1x32xf32> to vector<8x32xf32>
    %118 = arith.addf %116, %117 : vector<8x32xf32>
    %119 = arith.addf %108, %118 : vector<8x32xf32>
    %cst_49 = arith.constant dense<0.000000e+00> : vector<8xf32>
    %120 = vector.multi_reduction <add>, %119, %cst_49 [1] : vector<8x32xf32> to vector<8xf32>
    %121 = vector.shape_cast %120 : vector<8xf32> to vector<8x1xf32>
    %cst_50 = arith.constant 3.200000e+01 : f32
    %122 = vector.broadcast %cst_50 : f32 to vector<8x1xf32>
    %123 = arith.divf %121, %122 : vector<8x1xf32>
    %124 = vector.broadcast %123 : vector<8x1xf32> to vector<8x32xf32>
    %125 = arith.subf %119, %124 : vector<8x32xf32>
    %126 = arith.mulf %125, %125 : vector<8x32xf32>
    %cst_51 = arith.constant dense<0.000000e+00> : vector<8xf32>
    %127 = vector.multi_reduction <add>, %126, %cst_51 [1] : vector<8x32xf32> to vector<8xf32>
    %128 = vector.shape_cast %127 : vector<8xf32> to vector<8x1xf32>
    %cst_52 = arith.constant 3.200000e+01 : f32
    %129 = vector.broadcast %cst_52 : f32 to vector<8x1xf32>
    %130 = arith.divf %128, %129 : vector<8x1xf32>
    %cst_53 = arith.constant 9.99999974E-6 : f32
    %131 = vector.broadcast %cst_53 : f32 to vector<8x1xf32>
    %132 = arith.addf %130, %131 : vector<8x1xf32>
    %133 = math.rsqrt %132 : vector<8x1xf32>
    %134 = vector.broadcast %133 : vector<8x1xf32> to vector<8x32xf32>
    %135 = arith.mulf %125, %134 : vector<8x32xf32>
    %136 = vector.broadcast %6 : vector<1x32xf32> to vector<8x32xf32>
    %137 = arith.mulf %135, %136 : vector<8x32xf32>
    %138 = vector.broadcast %7 : vector<1x32xf32> to vector<8x32xf32>
    %139 = arith.addf %137, %138 : vector<8x32xf32>
    %c0_54 = arith.constant 0 : index
    %c0_55 = arith.constant 0 : index
    %c0_56 = arith.constant 0 : index
    %140 = vector.load %arg8[%c0_54, %c0_55, %c0_56] : memref<1x8x32xf32, #tpu.memory_space<vmem>>, vector<1x8x32xf32>
    %141 = vector.shape_cast %140 : vector<1x8x32xf32> to vector<8x32xf32>
    %142 = vector.shape_cast %139 : vector<8x32xf32> to vector<1x8x32xf32>
    tpu.vector_store %arg8[%c0_54, %c0_55, %c0_56], %142 {strides = array<i32>} : memref<1x8x32xf32, #tpu.memory_space<vmem>>, vector<1x8x32xf32>,
    return
  }
  func.func @transform_0(%arg0: i32, %arg1: i32) -> (i32, i32, i32) {
    %c0_i32 = arith.constant 0 : i32
    %c0_i32_0 = arith.constant 0 : i32
    return %arg0, %arg1, %c0_i32 : i32, i32, i32
  }
  func.func @transform_1(%arg0: i32, %arg1: i32) -> (i32, i32) {
    %c0_i32 = arith.constant 0 : i32
    %c0_i32_0 = arith.constant 0 : i32
    %c0_i32_1 = arith.constant 0 : i32
    return %c0_i32, %c0_i32_0 : i32, i32
  }
  func.func @transform_2(%arg0: i32, %arg1: i32) -> (i32, i32) {
    %c0_i32 = arith.constant 0 : i32
    %c0_i32_0 = arith.constant 0 : i32
    %c0_i32_1 = arith.constant 0 : i32
    return %c0_i32, %c0_i32_0 : i32, i32
  }
  func.func @transform_3(%arg0: i32, %arg1: i32) -> (i32, i32) {
    %c0_i32 = arith.constant 0 : i32
    %c0_i32_0 = arith.constant 0 : i32
    %c0_i32_1 = arith.constant 0 : i32
    return %c0_i32, %c0_i32_0 : i32, i32
  }
  func.func @transform_4(%arg0: i32, %arg1: i32) -> (i32, i32) {
    %c0_i32 = arith.constant 0 : i32
    %c0_i32_0 = arith.constant 0 : i32
    %c0_i32_1 = arith.constant 0 : i32
    return %c0_i32, %c0_i32_0 : i32, i32
  }
  func.func @transform_5(%arg0: i32, %arg1: i32) -> (i32, i32) {
    %c0_i32 = arith.constant 0 : i32
    %c0_i32_0 = arith.constant 0 : i32
    %c0_i32_1 = arith.constant 0 : i32
    return %c0_i32, %c0_i32_0 : i32, i32
  }
  func.func @transform_6(%arg0: i32, %arg1: i32) -> (i32, i32, i32) {
    %c0_i32 = arith.constant 0 : i32
    %c0_i32_0 = arith.constant 0 : i32
    return %arg0, %arg1, %c0_i32 : i32, i32, i32
  }
}

</mosaic_0001>

<bundles_post_ra>
// kernel: tpu_custom_call.1
= control target key start
LH: loop header
LB: loop body
LE: loop exit
PB: predicated region body
PF: predicated region fallthrough
CT: control target
= control target key end

     0   :  { %11 = vsyncpa [#allocation3], 0  ;;  %s2218_s0 = inlined_call_operand.vmem [shape: f32[2,8,32], index: 0, kind: input, shape index: {}]   ;;  %s2219_s1 = inlined_call_operand.vmem [shape: f32[32,96], index: 1, kind: input, shape index: {}]   ;;  %s2220_s2 = inlined_call_operand.vmem [shape: f32[32,32], index: 2, kind: input, shape index: {}]   ;;  %s2221_s3 = inlined_call_operand.vmem [shape: f32[32,128], index: 3, kind: input, shape index: {}]   ;;  %s2222_s4 = inlined_call_operand.vmem [shape: f32[128,32], index: 4, kind: input, shape index: {}]   ;;  %s2223_s5 = inlined_call_operand.vmem [shape: f32[1,1024], index: 5, kind: input, shape index: {}]   ;;  %s2224_s6 = inlined_call_operand.hbm [shape: f32[2,8,32], index: 6, kind: output, shape index: {}]  }
   0x1   :  { %13 = vsyncpa [#allocation3 + $0x1], 0  ;;  %s1908_s21 = smov 0   ;;  %s1910_s22 = smov 0  }
   0x2   :  { %s1912_s23 = smov 0   ;;  %s1914_s24 = smov 0  }
   0x3   :  { %s1916_s25 = smov 0   ;;  %s1918_s26 = smov 0  }
   0x4 LB: > { %s1451_s27 = sadd.s32 4294967295, %s1853_s26   ;;  %s1452_s28 = sadd.s32 4294967294, %s1853_s26   ;;  %s1853_s26 = sphi %s1918_s26, %s19_s26   ;;  %s1849_s25 = sphi %s1916_s25, %s2231_s25   ;;  %s1845_s24 = sphi %s1914_s24, %s2230_s24   ;;  %s1841_s23 = sphi %s1912_s23, %s2229_s23   ;;  %s1837_s22 = sphi %s1910_s22, %s2228_s22   ;;  %s1833_s21 = sphi %s1908_s21, %s2227_s21  }
   0x5   : > { %s31_s29 = sadd.s32 1, %s1849_s25  ;;  %s173_s30 = sadd.s32 1, %s1841_s23 }
   0x6   : > { %p33_p0 = scmp.ge.s32.totalorder %s31_s29, 2  ;;  %p183_p1 = scmp.ne.s32.totalorder %s1841_s23, %s1837_s22 }
   0x7   : > { %p184_p2 = scmp.eq.s32.totalorder %s1451_s27, 1  ;;  %p189_p3 = scmp.ne.s32.totalorder %s1837_s22, %s1833_s21 }
   0x8   : > { %s2233_s29 = smov (%p33_p0, %s31_s29), 0  ;;  %p190_p5 = scmp.eq.s32.totalorder %s1452_s28, 1 }
   0x9   : > { %p1948_p4 = por %p184_p2, %p183_p1  ;;  %s168_s8 = ssub.s32 %s1849_s25, %s2233_s29 }
   0xa   : > { %p1455_p6 = scmp.ge.s32.totalorder %s1853_s26, 1  ;;  %p171_p7 = scmp.eq.s32.totalorder %s168_s8, 0 }
   0xb   : > { %p1955_p8 = por %p190_p5, %p189_p3  ;;  %p233_p9 = scmp.lt.s32.totalorder %s1853_s26, 3 }
   0xc   : > { %s1961_s10 = scalar_select %p171_p7, %s1841_s23, %s173_s30  }
   0xd   : > { %p234_p10 = pnand %p1455_p6, %p233_p9 }
   0xe   : > { %v281_v0 = vld [vmem:[%s2219_s1] sm:$0xff] (!%p234_p10)  ;;  %v282_v1 = vld [vmem:[%s2219_s1 + $0x8] sm:$0xff] (!%p234_p10)  ;;  %v283_v2 = vld [vmem:[%s2219_s1 + $0x10] sm:$0xff] (!%p234_p10)  ;;  %v1855_v3 = vmov (!%p234_p10), 0.0|0.0   ;;  %vm1856_vm0 = vmmov (!%p234_p10), 0   ;;  %v1857_v6 = vmov (!%p234_p10), 0.0  }
   0xf   : > { %237 = sbr.rel (%p234_p10) target bundleno = 2558 (0x9fe), region = 44  ;;  %1641 = vmatprep.subr.bf16.mxu1 (!%p234_p10), %v1855_v3  ;;  %v1642_v4 = vpack.c.bf16 (!%p234_p10), %v282_v1, %v281_v0  ;;  %v284_v5 = vld [vmem:[%s2219_s1 + $0x18] sm:$0xff] (!%p234_p10)  ;;  %1541 = vmatprep.mubr.msk.f32.mxu1 (!%p234_p10), %vm1856_vm0, %v1857_v6  ;;  %p265_p11 = scmp.lt.s32.totalorder (!%p234_p10), %s1845_s24, 1  ;;  %vm291_vm1 = vcmask (!%p234_p10), 261120   ;;  %v1458_v9 = vld [vmem:[%s2223_s5] ss:$0 sm:$0xff] (!%p234_p10) }
  0x10   : > { %1554 = vmatprep.subr.mxu0 (!%p234_p10), %v1857_v6  ;;  %1556 = vmatprep.mubr.msk.f32.mxu0 (!%p234_p10), %vm1856_vm0, %v1857_v6  ;;  %v1645_v7 = vpack.c.bf16 (!%p234_p10), %v284_v5, %v283_v2  ;;  %s1858_s12 = smov (!%p234_p10), 96   ;;  %s1859_s13 = smov (!%p234_p10), 120   ;;  %vm369_vm2 = vcmask (!%p234_p10), 64512   ;;  %vm1044_vm3 = vcmask (!%p234_p10), 130048   ;;  %vm1046_vm4 = vcmask (!%p234_p10), 195584  }
  0x11   : > { %1643 = vmatpush3.bf16.msra.mxu1 (!%p234_p10), %v1642_v4  ;;  %s1860_s14 = smov (!%p234_p10), 88   ;;  %s1861_s15 = smov (!%p234_p10), 80  }
  0x12   : > { %1644 = vmatprep.subr.bf16.mxu1 (!%p234_p10), %v1855_v3  ;;  %s1862_s16 = smov (!%p234_p10), 112   ;;  %s1863_s17 = smov (!%p234_p10), 72  }
  0x13   : > { %s1864_s18 = smov (!%p234_p10), 104   ;;  %s1867_s27 = smov (!%p234_p10), 48  }
  0x14   : > { %s1868_s28 = smov (!%p234_p10), 40  }
  0x15   : > { %1646 = vmatpush3.bf16.msra.mxu1 (!%p234_p10), %v1645_v7  ;;  %v1048_v7 = vld [vmem:[%s2220_s2] sm:$0xff] (!%p234_p10) }
  0x16   : > { %s266_s19 = scalar_select %p265_p11, %s1845_s24, 1  ;;  %1544 = vmatprep.subr.mxu1 %v1857_v6 }
  0x18   : > { %s1457_s20 = sshll.u32 %s266_s19, 3  ;;  %s1865_s19 = smov 56  }
  0x19   : > { %s271_s30 = scalar_lea.vmem %s2218_s0, %s1457_s20  ;;  %s1866_s20 = smov 64  }
  0x1a   : > { %v1987_v8 = vld [vmem:[%s271_s30] sm:$0xff] }
  0x1b   : > { %1542 = vmatmul.mubr.msk.f32.vlgmr.msra.gmra.mrb[0].mxu1 %vm291_vm1, %v1987_v8 }
  0x1c   : > { %1546 = vmatprep.mubr.msk.f32.mxu1 %vm1856_vm0, %v1857_v6 }
  0xee   : > { %v361_v10 = vpop.f32.mrb[0].mxu1 }
  0xef   : > { %v1997_v11 = vadd.f32 %v1458_v9, %v361_v10  ;;  %v1543_v12 = vpop.f32.mrb[1].mxu1  ;;  %v1049_v9 = vld [vmem:[%s2220_s2 + $0x8] sm:$0xff] }
  0xf0   : > { %v1648_v10 = vpack.c.bf16 %v1049_v9, %v1048_v7  ;;  %v1475_v9 = vld [vmem:[%s2223_s5 + $0x3] ss:$0 sm:$0xff] }
  0xf1   : > { %367 = vrot.lane.b32.xlu0 %v1997_v11, %s1858_s12  ;;  %v365_v13 = vmul.f32 0.35355338, %v1997_v11 }
  0xf3   : > { %533 = vrot.lane.b32.xlu1 %v365_v13, %s1859_s13  ;;  %s1869_s13 = smov 8  }
  0xf5   : > { %535 = vrot.lane.b32.xlu0 %v1997_v11, %s1860_s14  ;;  %s262_s14 = sand.u32 1, %s1837_s22  }
  0xf6   : > { %s1366_s12 = scalar_lea.sflag [#allocation3], %s262_s14 }
  0xf7   : > { %701 = vrot.lane.b32.xlu1 %v1997_v11, %s1861_s15  ;;  %s1456_s15 = sshll.u32 %s262_s14, 3 }
  0xf9   : > { %699 = vrot.lane.b32.xlu0 %v365_v13, %s1862_s16 }
  0xfb   : > { %867 = vrot.lane.b32.xlu1 %v1997_v11, %s1863_s17 }
  0xfd   : > { %865 = vrot.lane.b32.xlu0 %v365_v13, %s1864_s18  ;;  %s1870_s18 = smov 16  }
 0x163   : > { %v368_v14 = vpop.permute.xlu0 %367 }
 0x164   : > { %1545 = vmatpush3.xpose.msk.msra.mxu1 %vm369_vm2, %v368_v14 }
 0x165   : > { %v534_v15 = vpop.permute.xlu1 %533  ;;  %1549 = vmatprep.subr.mxu1 %v1857_v6 }
 0x167   : > { %v536_v16 = vpop.permute.xlu0 %535  ;;  %1547 = vmatmul.mubr.msk.f32.vlgmr.msra.gmra.mrb[2].mxu1 %vm369_vm2, %v365_v13 }
 0x168   : > { %1555 = vmatpush3.xpose.msk.msra.mxu0 %vm369_vm2, %v536_v16  ;;  %1551 = vmatprep.mubr.msk.f32.mxu1 %vm1856_vm0, %v1857_v6  ;;  %v1051_v16 = vld [vmem:[%s2220_s2 + $0x18] sm:$0xff] }
 0x169   : > { %v702_v17 = vpop.permute.xlu1 %701  ;;  %1564 = vmatprep.subr.mxu0 %v1857_v6 }
 0x16b   : > { %1557 = vmatmul.mubr.msk.f32.vlgmr.msra.gmra.mrb[0].mxu0 %vm369_vm2, %v534_v15  ;;  %v700_v18 = vpop.permute.xlu0 %699  ;;  %v1050_v15 = vld [vmem:[%s2220_s2 + $0x10] sm:$0xff] }
 0x16c   : > { %1565 = vmatpush3.xpose.msk.msra.mxu0 %vm369_vm2, %v702_v17  ;;  %1566 = vmatprep.mubr.msk.f32.mxu0 %vm1856_vm0, %v1857_v6  ;;  %v1651_v17 = vpack.c.bf16 %v1051_v16, %v1050_v15 }
 0x16d   : > { %1574 = vmatprep.subr.mxu0 %v1857_v6  ;;  %v868_v19 = vpop.permute.xlu1 %867 }
 0x16f   : > { %1567 = vmatmul.mubr.msk.f32.vlgmr.msra.gmra.mrb[2].mxu0 %vm369_vm2, %v700_v18  ;;  %v866_v20 = vpop.permute.xlu0 %865 }
 0x170   : > { %1575 = vmatpush3.xpose.msk.msra.mxu0 %vm369_vm2, %v868_v19  ;;  %1576 = vmatprep.mubr.msk.f32.mxu0 %vm1856_vm0, %v1857_v6 }
 0x171   : > { %1659 = vmatprep.subr.bf16.mxu0 %v1855_v3 }
 0x173   : > { %1577 = vmatmul.mubr.msk.f32.vlgmr.msra.gmra.mrb[4].mxu0 %vm369_vm2, %v866_v20 }
 0x174   : > { %1638 = vmatprep.mubr.msk.f32.mxu0 %vm1856_vm0, %v1857_v6 }
 0x23a   : > { %v441_v21 = vpop.f32.mrb[2].mxu1 }
 0x23b   : > { %v1548_v22 = vpop.f32.mrb[3].mxu1  ;;  %v445_v23 = vsel %vm369_vm2, %v441_v21, -inf }
 0x23c   : > { %446 = vmax.xlane.f32.xlu1 %v445_v23 }
 0x23e   : > { %v607_v24 = vpop.f32.mrb[0].mxu0 }
 0x23f   : > { %v1558_v25 = vpop.f32.mrb[1].mxu0  ;;  %v611_v26 = vsel %vm369_vm2, %v607_v24, -inf }
 0x240   : > { %612 = vmax.xlane.f32.xlu0 %v611_v26 }
 0x242   : > { %v773_v27 = vpop.f32.mrb[2].mxu0 }
 0x243   : > { %v1568_v28 = vpop.f32.mrb[3].mxu0  ;;  %v777_v29 = vsel %vm369_vm2, %v773_v27, -inf }
 0x244   : > { %778 = vmax.xlane.f32.xlu0 %v777_v29  ;;  %v1472_v28 = vld [vmem:[%s2223_s5 + $0x1] ss:$0 sm:$0xff] }
 0x246   : > { %v939_v30 = vpop.f32.mrb[4].mxu0 }
 0x247   : > { %v1578_v31 = vpop.f32.mrb[5].mxu0  ;;  %v943_v32 = vsel %vm369_vm2, %v939_v30, -inf }
 0x248   : > { %944 = vmax.xlane.f32.xlu1 %v943_v32 }
 0x259   : > { %623 = vrot.lane.b32.xlu1 %v1997_v11, %s1865_s19  ;;  %s1871_s19 = smov 24  }
 0x2c9   : > { %v447_v33 = vpop.xlane.xlu1 %446 }
 0x2ca   : > { %v448_v34 = vsub.f32 %v441_v21, %v447_v33 }
 0x2cc   : > { %v449_v35 = vmul.f32 1.442695, %v448_v34 }
 0x2cd   : > { %v613_v36 = vpop.xlane.xlu0 %612 }
 0x2ce   : > { %1755 = vpow2.f32 %v449_v35  ;;  %v614_v37 = vsub.f32 %v607_v24, %v613_v36 }
 0x2d0   : > { %v615_v38 = vmul.f32 1.442695, %v614_v37 }
 0x2d1   : > { %v779_v48 = vpop.xlane.xlu0 %778 }
 0x2d2   : > { %1757 = vpow2.f32 %v615_v38  ;;  %v780_v49 = vsub.f32 %v773_v27, %v779_v48 }
 0x2d4   : > { %v781_v50 = vmul.f32 1.442695, %v780_v49  ;;  %v1248_v49 = vld [vmem:[%s2222_s4 + $0x20] sm:$0xff] }
 0x2d5   : > { %v945_v39 = vpop.xlane.xlu1 %944 }
 0x2d6   : > { %v946_v40 = vsub.f32 %v939_v30, %v945_v39  ;;  %v1161_v39 = vld [vmem:[%s2221_s3 + $0x8] sm:$0xff] }
 0x2d8   : > { %v1756_v41 = vpop.eup %1755  ;;  %v947_v42 = vmul.f32 1.442695, %v946_v40 }
 0x2d9   : > { %v451_v43 = vsel %vm369_vm2, %v1756_v41, 0.0  ;;  %v624_v53 = vpop.permute.xlu1 %623 }
 0x2da   : > { %1759 = vpow2.f32 %v947_v42  ;;  %452 = vadd.xlane.f32.xlu0 %v451_v43  ;;  %v1244_v43 = vld [vmem:[%s2222_s4] sm:$0xff] }
 0x2db   : > { %1761 = vpow2.f32 %v781_v50  ;;  %v1249_v50 = vld [vmem:[%s2222_s4 + $0x28] sm:$0xff] }
 0x2dc   : > { %v1758_v44 = vpop.eup %1757 }
 0x2dd   : > { %v617_v45 = vsel %vm369_vm2, %v1758_v44, 0.0 }
 0x2de   : > { %618 = vadd.xlane.f32.xlu1 %v617_v45  ;;  %v1246_v45 = vld [vmem:[%s2222_s4 + $0x10] sm:$0xff] }
 0x2e4   : > { %v1760_v46 = vpop.eup %1759 }
 0x2e5   : > { %v949_v47 = vsel %vm369_vm2, %v1760_v46, 0.0  ;;  %v1762_v51 = vpop.eup %1761 }
 0x2e6   : > { %950 = vadd.xlane.f32.xlu1 %v949_v47  ;;  %v783_v52 = vsel %vm369_vm2, %v1762_v51, 0.0  ;;  %v1247_v47 = vld [vmem:[%s2222_s4 + $0x18] sm:$0xff] }
 0x2e7   : > { %v1663_v48 = vpack.c.bf16 %v1247_v47, %v1246_v45 }
 0x2f0   : > { %457 = vrot.lane.b32.xlu0 %v1997_v11, %s1866_s20  ;;  %s1482_s20 = sshll.u32 %s1845_s24, 7  ;;  %s1872_s24 = smov [#allocation2]  }
 0x2f1   : > { %s2170_s11 = scalar_lea.hbm %s2224_s6, %s1482_s20 }
 0x2f7   : > { %789 = vrot.lane.b32.xlu1 %v1997_v11, %s1867_s27  ;;  %s264_s27 = scalar_lea.vmem [#allocation2], %s1456_s15  ;;  %s1779_s15 = sshll.u32 %s1872_s24, 4  ;;  %s1780_s15 = int_to_ptr.vmem [resolvable:$false] %s1779_s15 }
 0x2f8   : > { %s1781_s16 = scalar_lea.vmem %s1780_s15, 256 }
 0x30f   : > { %784 = vadd.xlane.f32.xlu0 %v783_v52  ;;  %v1250_v52 = vld [vmem:[%s2222_s4 + $0x30] sm:$0xff] }
 0x325   : > { %955 = vrot.lane.b32.xlu0 %v1997_v11, %s1868_s28  ;;  %s1380_s28 = sshll.u32 %s264_s27, 4  ;;  %s2172_s28 = int_to_ptr.vmem [resolvable:$true] %s1380_s28 }
 0x326   : > { %p1782_p1 = scmp.lt.s32.totalorder %s2172_s28, %s1780_s15 }
 0x367   : > { %v453_v54 = vpop.xlane.xlu0 %452 }
 0x368   : > { %1763 = vrcp.f32 %v453_v54 }
 0x36b   : > { %v458_v55 = vpop.permute.xlu0 %457  ;;  %v619_v56 = vpop.xlane.xlu1 %618 }
 0x36c   : > { %1765 = vrcp.f32 %v619_v56  ;;  %1550 = vmatpush3.msra.mxu1 %v458_v55  ;;  %v1252_v55 = vld [vmem:[%s2222_s4 + $0x40] sm:$0xff]  ;;  %v1253_v56 = vld [vmem:[%s2222_s4 + $0x48] sm:$0xff] }
 0x36d   : > { %1559 = vmatprep.subr.mxu1 %v1857_v6 }
 0x372   : > { %v1764_v57 = vpop.eup %1763 }
 0x373   : > { %v456_v58 = vmul.f32 %v1764_v57, %v1756_v41  ;;  %v951_v59 = vpop.xlane.xlu1 %950  ;;  %v1163_v41 = vld [vmem:[%s2221_s3 + $0x18] sm:$0xff]  ;;  %v1672_v57 = vpack.c.bf16 %v1253_v56, %v1252_v55 }
 0x375   : > { %1552 = vmatmul.mubr.msk.f32.vlgmr.msra.gmra.mrb[4].mxu1 %vm369_vm2, %v456_v58  ;;  %v1254_v58 = vld [vmem:[%s2222_s4 + $0x50] sm:$0xff] }
 0x376   : > { %v1766_v60 = vpop.eup %1765  ;;  %1560 = vmatpush3.msra.mxu1 %v624_v53  ;;  %1561 = vmatprep.mubr.msk.f32.mxu1 %vm1856_vm0, %v1857_v6  ;;  %v1251_v53 = vld [vmem:[%s2222_s4 + $0x38] sm:$0xff] }
 0x377   : > { %v622_v61 = vmul.f32 %v1766_v60, %v1758_v44  ;;  %v790_v62 = vpop.permute.xlu1 %789  ;;  %1569 = vmatprep.subr.mxu1 %v1857_v6  ;;  %v1245_v44 = vld [vmem:[%s2222_s4 + $0x8] sm:$0xff]  ;;  %v1669_v54 = vpack.c.bf16 %v1251_v53, %v1250_v52 }
 0x379   : > { %1562 = vmatmul.mubr.msk.f32.vlgmr.msra.gmra.mrb[6].mxu1 %vm369_vm2, %v622_v61  ;;  %v1256_v61 = vld [vmem:[%s2222_s4 + $0x60] sm:$0xff] }
 0x37a   : > { %1570 = vmatpush3.msra.mxu1 %v790_v62  ;;  %1571 = vmatprep.mubr.msk.f32.mxu1 %vm1856_vm0, %v1857_v6  ;;  %v1257_v62 = vld [vmem:[%s2222_s4 + $0x68] sm:$0xff] }
 0x37b   : > { %1579 = vmatprep.subr.mxu1 %v1857_v6 }
 0x39c   : > { %v785_v63 = vpop.xlane.xlu0 %784 }
 0x39d   : > { %1767 = vrcp.f32 %v785_v63  ;;  %v1678_v63 = vpack.c.bf16 %v1257_v62, %v1256_v61 }
 0x39e   : > { %1769 = vrcp.f32 %v951_v59  ;;  %v1255_v59 = vld [vmem:[%s2222_s4 + $0x58] sm:$0xff] }
 0x39f   : > { %v1675_v60 = vpack.c.bf16 %v1255_v59, %v1254_v58 }
 0x3a0   : > { %v956_v4 = vpop.permute.xlu0 %955 }
 0x3a7   : > { %v1768_v0 = vpop.eup %1767 }
 0x3a8   : > { %v788_v1 = vmul.f32 %v1768_v0, %v1762_v51  ;;  %v1770_v2 = vpop.eup %1769  ;;  %v1666_v51 = vpack.c.bf16 %v1249_v50, %v1248_v49 }
 0x3a9   : > { %v954_v5 = vmul.f32 %v1770_v2, %v1760_v46  ;;  %v1660_v46 = vpack.c.bf16 %v1245_v44, %v1244_v43 }
 0x3aa   : > { %1572 = vmatmul.mubr.msk.f32.vlgmr.msra.gmra.mrb[8].mxu1 %vm369_vm2, %v788_v1 }
 0x3ab   : > { %1580 = vmatpush3.msra.mxu1 %v956_v4  ;;  %1581 = vmatprep.mubr.msk.f32.mxu1 %vm1856_vm0, %v1857_v6 }
 0x3ac   : > { %1647 = vmatprep.subr.bf16.mxu1 %v1855_v3  ;;  %1661 = vmatpush3.bf16.msra.mxu0 %v1660_v46 }
 0x3ad   : > { %1662 = vmatprep.subr.bf16.mxu0 %v1855_v3 }
 0x3ae   : > { %1582 = vmatmul.mubr.msk.f32.vlgmr.msra.gmra.mrb[10].mxu1 %vm369_vm2, %v954_v5  ;;  %v1474_v5 = vld [vmem:[%s2223_s5 + $0x2] ss:$0 sm:$0xff] }
 0x3af   : > { %1592 = vmatprep.mubr.msk.f32.mxu1 %vm1856_vm0, %v1857_v6  ;;  %1649 = vmatpush3.bf16.msra.mxu1 %v1648_v10 }
 0x3b0   : > { %1650 = vmatprep.subr.bf16.mxu1 %v1855_v3  ;;  %1664 = vmatpush3.bf16.msra.mxu0 %v1663_v48 }
 0x3b1   : > { %1665 = vmatprep.subr.bf16.mxu0 %v1855_v3 }
 0x3b3   : > { %1652 = vmatpush3.bf16.msra.mxu1 %v1651_v17 }
 0x3b4   : > { %1653 = vmatprep.subr.bf16.mxu1 %v1855_v3  ;;  %1667 = vmatpush3.bf16.msra.mxu0 %v1666_v51 }
 0x3b5   : > { %1668 = vmatprep.subr.bf16.mxu0 %v1855_v3 }
 0x3b8   : > { %1670 = vmatpush3.bf16.msra.mxu0 %v1669_v54 }
 0x3b9   : > { %1671 = vmatprep.subr.bf16.mxu0 %v1855_v3 }
 0x3bc   : > { %1673 = vmatpush3.bf16.msra.mxu0 %v1672_v57 }
 0x3bd   : > { %1674 = vmatprep.subr.bf16.mxu0 %v1855_v3 }
 0x3c0   : > { %1676 = vmatpush3.bf16.msra.mxu0 %v1675_v60 }
 0x3c1   : > { %1677 = vmatprep.subr.bf16.mxu0 %v1855_v3 }
 0x3c4   : > { %1679 = vmatpush3.bf16.msra.mxu0 %v1678_v63 }
 0x3c5   : > { %1680 = vmatprep.subr.bf16.mxu0 %v1855_v3 }
 0x448   : > { %v529_v11 = vpop.f32.mrb[4].mxu1 }
 0x449   : > { %v1553_v12 = vpop.f32.mrb[5].mxu1 }
 0x44a   : > { %v1259_v12 = vld [vmem:[%s2222_s4 + $0x78] sm:$0xff] }
 0x44c   : > { %v695_v13 = vpop.f32.mrb[6].mxu1 }
 0x44d   : > { %1032 = vrot.lane.b32.xlu1 %v695_v13, %s1869_s13  ;;  %v1563_v14 = vpop.f32.mrb[7].mxu1  ;;  %s1775_s13 = scalar_lea.vmem %s2172_s28, 128 }
 0x44e   : > { %v1476_v14 = vld [vmem:[%s2223_s5 + $0x4] ss:$0 sm:$0xff]  ;;  %p1776_p12 = scmp.ne.s32.totalorder %s2172_s28, %s1775_s13  ;;  %p1783_p2 = scmp.lt.s32.totalorder %s1781_s16, %s1775_s13 }
 0x450   : > { %p1777_p13 = pnand %p1776_p12, %p1948_p4  ;;  %p1784_p3 = por %p1783_p2, %p1782_p1 }
 0x452   : > { %p1778_p0 = pneg %p1777_p13 }
 0x454   : > { %p1785_p5 = pnand %p1784_p3, %p1778_p0 }
 0x47d   : > { %v861_v18 = vpop.f32.mrb[8].mxu1 }
 0x47e   : > { %1036 = vrot.lane.b32.xlu0 %v861_v18, %s1870_s18  ;;  %v1573_v19 = vpop.f32.mrb[9].mxu1 }
 0x47f   : > { %v1478_v19 = vld [vmem:[%s2223_s5 + $0x5] ss:$0 sm:$0xff] }
 0x481   : > { %v1027_v20 = vpop.f32.mrb[10].mxu1 }
 0x482   : > { %1040 = vrot.lane.b32.xlu1 %v1027_v20, %s1871_s19  ;;  %v1583_v21 = vpop.f32.mrb[11].mxu1 }
 0x4bf   : > { %v1033_v22 = vpop.permute.xlu1 %1032 }
 0x4c0   : > { %v1043_v24 = vsel %vm369_vm2, %v529_v11, %v1033_v22 }
 0x4f0   : > { %v1037_v23 = vpop.permute.xlu0 %1036 }
 0x4f1   : > { %v1045_v25 = vsel %vm1044_vm3, %v1043_v24, %v1037_v23 }
 0x4f4   : > { %v1041_v26 = vpop.permute.xlu1 %1040 }
 0x4f5   : > { %v1047_v27 = vsel %vm1046_vm4, %v1045_v25, %v1041_v26 }
 0x4f6   : > { %1593 = vmatmul.mubr.msk.f32.vlgmr.msra.gmra.mrb[12].mxu1 %vm291_vm1, %v1047_v27 }
 0x4f7   : > { %1603 = vmatprep.mubr.msk.f32.mxu1 %vm1856_vm0, %v1857_v6  ;;  %v1160_v6 = vld [vmem:[%s2221_s3] sm:$0xff] }
 0x4f8   : > { %v1654_v40 = vpack.c.bf16 %v1161_v39, %v1160_v6 }
 0x4fa   : > { %1655 = vmatpush3.bf16.msra.mxu1 %v1654_v40 }
 0x4fb   : > { %1656 = vmatprep.subr.bf16.mxu1 %v1855_v3  ;;  %v1258_v3 = vld [vmem:[%s2222_s4 + $0x70] sm:$0xff] }
 0x4fc   : > { %v1681_v13 = vpack.c.bf16 %v1259_v12, %v1258_v3 }
 0x4fe   : > { %1682 = vmatpush3.bf16.msra.mxu0 %v1681_v13 }
 0x5c9   : > { %v1127_v29 = vpop.f32.mrb[12].mxu1 }
 0x5ca   : > { %v1128_v30 = vadd.f32 %v1472_v28, %v1127_v29  ;;  %v1594_v31 = vpop.f32.mrb[13].mxu1 }
 0x5cc   : > { %v1131_v32 = vadd.f32 %v1128_v30, %v1987_v8  ;;  %v1162_v8 = vld [vmem:[%s2221_s3 + $0x10] sm:$0xff] }
 0x5cd   : > { %v1657_v42 = vpack.c.bf16 %v1163_v41, %v1162_v8 }
 0x5ce   : > { %v1132_v33 = vsel %vm291_vm1, %v1131_v32, 0.0 }
 0x5cf   : > { %1133 = vadd.xlane.f32.xlu0 %v1132_v33  ;;  %1658 = vmatpush3.bf16.msra.mxu1 %v1657_v42 }
 0x65c   : > { %v1134_v34 = vpop.xlane.xlu0 %1133 }
 0x65d   : > { %v1136_v35 = vmul.f32 0.03125, %v1134_v34  ;;  %v1479_v34 = vld [vmem:[%s2223_s5 + $0x6] ss:$0 sm:$0xff] }
 0x65f   : > { %v1137_v36 = vsub.f32 %v1131_v32, %v1136_v35 }
 0x661   : > { %v1138_v37 = vmul.f32 %v1137_v36, %v1137_v36 }
 0x663   : > { %v1139_v38 = vsel %vm291_vm1, %v1138_v37, 0.0 }
 0x664   : > { %1140 = vadd.xlane.f32.xlu1 %v1139_v38 }
 0x6f1   : > { %v1141_v0 = vpop.xlane.xlu1 %1140 }
 0x6f2   : > { %v1142_v1 = vmul.f32 0.03125, %v1141_v0 }
 0x6f4   : > { %v1143_v2 = vadd.f32 1e-05, %v1142_v1 }
 0x6f6   : > { %1771 = vrsqrt.f32 %v1143_v2 }
 0x700   : > { %v1772_v4 = vpop.eup %1771 }
 0x701   : > { %v1145_v7 = vmul.f32 %v1772_v4, %v1137_v36  ;;  %v1480_v36 = vld [vmem:[%s2223_s5 + $0x7] ss:$0 sm:$0xff] }
 0x703   : > { %v1152_v10 = vmul.f32 %v1474_v5, %v1145_v7 }
 0x705   : > { %v1159_v11 = vadd.f32 %v1475_v9, %v1152_v10 }
 0x707   : > { %1604 = vmatmul.mubr.msk.f32.vlgmr.msra.gmra.mrb[14].mxu1 %vm291_vm1, %v1159_v11 }
 0x7da   : > { %v1239_v15 = vpop.f32.mrb[14].mxu1 }
 0x7db   : > { %v1240_v16 = vadd.f32 %v1476_v14, %v1239_v15  ;;  %v1605_v17 = vpop.f32.mrb[15].mxu1 }
 0x7dd   : > { %v1243_v18 = vmax.f32 %v1240_v16, 0.0 }
 0x7df   : > { %1639 = vmatmul.mubr.f32.vlgmr.msra.gmra.mrb[6].mxu0 %v1243_v18 }
 0x8b2   : > { %v1332_v20 = vpop.f32.mrb[6].mxu0 }
 0x8b3   : > { %v1333_v21 = vadd.f32 %v1478_v19, %v1332_v20  ;;  %v1640_v22 = vpop.f32.mrb[7].mxu0 }
 0x8b5   : > { %v1336_v23 = vadd.f32 %v1333_v21, %v1159_v11 }
 0x8b7   : > { %v1337_v24 = vsel %vm291_vm1, %v1336_v23, 0.0 }
 0x8b8   : > { %1338 = vadd.xlane.f32.xlu0 %v1337_v24 }
 0x945   : > { %v1339_v25 = vpop.xlane.xlu0 %1338 }
 0x946   : > { %v1340_v26 = vmul.f32 0.03125, %v1339_v25 }
 0x948   : > { %v1341_v27 = vsub.f32 %v1336_v23, %v1340_v26 }
 0x94a   : > { %v1342_v28 = vmul.f32 %v1341_v27, %v1341_v27 }
 0x94c   : > { %v1343_v29 = vsel %vm291_vm1, %v1342_v28, 0.0 }
 0x94d   : > { %1344 = vadd.xlane.f32.xlu0 %v1343_v29 }
 0x9da   : > { %v1345_v30 = vpop.xlane.xlu0 %1344 }
 0x9db   : > { %v1346_v31 = vmul.f32 0.03125, %v1345_v30 }
 0x9dd   : > { %v1347_v32 = vadd.f32 1e-05, %v1346_v31 }
 0x9df   : > { %1773 = vrsqrt.f32 %v1347_v32 }
 0x9e9   : > { %v1774_v33 = vpop.eup %1773 }
 0x9ea   : > { %v1349_v35 = vmul.f32 %v1774_v33, %v1341_v27 }
 0x9ec   : > { %v1356_v37 = vmul.f32 %v1479_v34, %v1349_v35 }
 0x9ee   : > { %v1363_v38 = vadd.f32 %v1480_v36, %v1356_v37 }
 0x9f0   : > { %1364 = vst.msk [vmem:[%s264_s27] sm:$0xff] %vm291_vm1, %v1363_v38 }
 0x9f1   : > { %1788 = shalt.err (!%p1785_p5)
}
 0x9f2   : > { %s1789_s14 = scalar_lea.hbm %s2170_s11, 128  ;;  %s1793_s19 = scalar_lea.hbm %s2224_s6, 256 }
 0x9f3   : > { %p1790_p6 = scmp.ne.s32.totalorder %s2170_s11, %s1789_s14  ;;  %p1794_p10 = scmp.lt.u32.totalorder %s2170_s11, %s2224_s6 }
 0x9f4   : > { %p1795_p11 = scmp.lt.u32.totalorder %s1793_s19, %s1789_s14  ;;  %p1797_p13 = scmp.lt.u32.totalorder %s1789_s14, %s2170_s11 }
 0x9f5   : > { %p1791_p7 = pnand %p1790_p6, %p1948_p4 }
 0x9f6   : > { %p1796_p12 = por %p1795_p11, %p1794_p10 }
 0x9f7   : > { %p1792_p9 = pneg %p1791_p7 }
 0x9f8   : > { %p1798_p0 = por %p1797_p13, %p1796_p12 }
 0x9fa   : > { %p1799_p1 = pnand %p1798_p0, %p1792_p9 }
 0x9fc   : > { %1802 = shalt.err (!%p1799_p1)
}
 0x9fd   : > { %1683 = dma.vmem_to_hbm [thread:$0]  (%p1948_p4), %s2172_s28, 128, %s2170_s11, %s1366_s12  }
 0x9fe PF: > { %p1689_p2 = scmp.ge.s32.totalorder %s1853_s26, 2  ;;  %s1392_s30 = sand.u32 1, %s1833_s21  }
 0x9ff   : > { %s1393_s8 = scalar_lea.sflag [#allocation3], %s1392_s30 }
 0xa00   : > { %p1686_p3 = pnand %p1689_p2, %p1955_p8 }
 0xa02   : > { %1828 = dma.done.wait (!%p1686_p3), %s1393_s8, 128  }
 0xa03   : > { %1830 = vsyncadd (!%p1686_p3), %s1393_s8, 4294967168  ;;  %s19_s26 = sadd.s32 1, %s1853_s26   ;;  %s2227_s21 = smov %s1837_s22 }
 0xa04   : > { %p16_p5 = scmp.ge.s32.totalorder %s19_s26, 4   ;;  %s2228_s22 = smov %s1841_s23 }
 0xa05   : > { %s2229_s23 = smov %s1961_s10  ;;  %s2230_s24 = smov %s1849_s25 }
 0xa06   : > { %s2231_s25 = smov %s2233_s29  ;;  %18 = sbr.rel (!%p16_p5) target bundleno = 4 (0x4), region = 79 }
 0xa0d   :  { %1398 = vsyncpa [#allocation3], 1 }
 0xa0e   :  { %1400 = vsyncpa [#allocation3 + $0x1], 1 }

</bundles_post_ra>
